<compile_context>
chip_gen: v7x
topology: tpu7x:2x2x1
jax: 0.10.0
libtpu: 0.0.40
codegen_flags: <defaults>
</compile_context>

<pallas_src>
import jax
import jax.numpy as jnp
from jax.experimental import pallas as pl
from jax.experimental.pallas import tpu as pltpu

IN_F, H1_F, H2_F, OUT_F = 15, 20, 15, 1


def _round_up(x, m):
    return ((x + m - 1) // m) * m


def _mlp_kernel(x_ref, w1_ref, b1_ref, w2_ref, b2_ref, w3_ref, b3_ref, o_ref):
    cdt = w1_ref.dtype                         # MXU operand dtype (f32 or bf16)
    # (tb, 15) -> (15, tb): put batch on the 128-lane axis.  XLU transpose; the
    # XLU slot is otherwise idle here, so this is effectively free.
    xT = x_ref[...].T
    h1 = jnp.dot(w1_ref[...], xT.astype(cdt),
                 preferred_element_type=jnp.float32)                   # (20, tb)
    h1 = jnp.maximum(h1 + b1_ref[...], 0.0)                            # f32 ReLU
    h2 = jnp.dot(w2_ref[...], h1.astype(cdt),
                 preferred_element_type=jnp.float32)                   # (15, tb)
    h2 = jnp.maximum(h2 + b2_ref[...], 0.0)
    # Layer 3 (15 -> 1): VPU multiply + cross-sublane (XLU) reduce; avoids an
    # MXU pass whose useful output would be a single row.
    w3 = w3_ref[...]                                                    # (15, 1) f32
    o_ref[...] = jnp.sum(h2 * w3, axis=0, keepdims=True) + b3_ref[...]  # (1, tb)


def classify_net_forward(x, params, *, max_batch_tile=2048, compute_dtype=None):
    """x: (B, 15) -> (B, 1) float32.

    compute_dtype only affects the MXU operand dtype inside the kernel (x is
    read from HBM in its own dtype; weights are tiny).  Leave None on v5e /
    when x is f32; pass jnp.bfloat16 only if reduced-precision matmuls are OK.
    """
    w1, b1, w2, b2, w3, b3 = params
    B = x.shape[0]

    mxu_dtype = compute_dtype if compute_dtype is not None else x.dtype
    w1c = w1.astype(mxu_dtype)     # < 2 KiB total: free, stays VMEM-resident
    w2c = w2.astype(mxu_dtype)

    # --- batch tiling: batch lands on the lane axis inside the kernel, so
    # tiles are multiples of 128 (or one exact-shape block for tiny batches).
    mbt = max(128, (max_batch_tile // 128) * 128)
    tb = min(mbt, _round_up(B, 128))
    if B >= 256 and pl.cdiv(B, tb) < 2:
        # guarantee >= 2 grid steps: v7x megacore sharding + DMA/compute overlap
        tb = _round_up(pl.cdiv(B, 2), 128)
    if tb >= B:
        tb = B                      # single block with exact (untiled) shapes
    nsteps = pl.cdiv(B, tb)

    x_idx = lambda i: (i, 0)
    if nsteps >= 3:
        try:    # 3-deep buffering hides per-step DMA/issue latency on long grids
            x_spec = pl.BlockSpec((tb, IN_F), x_idx, pipeline_mode=pl.Buffered(3))
        except TypeError:           # BlockSpec without pipeline_mode support
            x_spec = pl.BlockSpec((tb, IN_F), x_idx)
    else:
        x_spec = pl.BlockSpec((tb, IN_F), x_idx)

    resident = lambda a: pl.BlockSpec(a.shape, lambda i: (0, 0))

    out = pl.pallas_call(
        _mlp_kernel,
        out_shape=jax.ShapeDtypeStruct((OUT_F, B), jnp.float32),
        grid=(nsteps,),
        in_specs=[
            x_spec,                               # x tile, native (B, 15) layout
            resident(w1c), resident(b1),          # weights / biases stay
            resident(w2c), resident(b2),          #   VMEM-resident (constant map)
            resident(w3), resident(b3),
        ],
        out_specs=pl.BlockSpec((OUT_F, tb), lambda i: (0, i)),  # lane-dense store
        compiler_params=pltpu.CompilerParams(
            dimension_semantics=("parallel",)),
    )(x, w1c, b1, w2c, b2, w3, b3)

    return out.reshape(B, 1)        # (1, B) -> PyTorch (B, 1); order-preserving


def init_params(key):
    """Deterministic init mirroring nn.Linear (weight: (out,in), bias: (out,)).

    Stored kernel-ready: W1 (20,15), b1 (20,1), W2 (15,20), b2 (15,1),
    W3 transposed to (15,1) for the VPU-multiply last layer, b3 (1,1).
    """
    dims = [(IN_F, H1_F), (H1_F, H2_F), (H2_F, OUT_F)]
    raw = []
    for i, (fan_in, fan_out) in enumerate(dims):
        kw, kb, key = jax.random.split(jax.random.fold_in(key, i), 3)
        bound = 1.0 / jnp.sqrt(fan_in)
        w = jax.random.uniform(kw, (fan_out, fan_in), jnp.float32, -bound, bound)
        b = jax.random.uniform(kb, (fan_out, 1), jnp.float32, -bound, bound)
        raw += [w, b]
    w1, b1, w2, b2, w3, b3 = raw
    return (w1, b1, w2, b2, w3.T, b3)      # w3.T: (15, 1)


def reference_forward(x, params):
    w1, b1, w2, b2, w3t, b3 = params
    h1 = jnp.maximum(x @ w1.T + b1[:, 0], 0.0)
    h2 = jnp.maximum(h1 @ w2.T + b2[:, 0], 0.0)
    return h2 @ w3t + b3                    # (B, 1)


if __name__ == "__main__":
    key = jax.random.PRNGKey(0)
    k_x, k_x2, k_p = jax.random.split(key, 3)
    params = init_params(k_p)

    # 1) tiny batch: single exact-shape block, no padding anywhere
    x = jax.random.normal(k_x, (8, IN_F), dtype=jnp.float32)
    out = jax.block_until_ready(classify_net_forward(x, params))
    ref = reference_forward(x, params)
    assert out.shape == (8, 1), out.shape
    assert jnp.allclose(out, ref, atol=1e-5, rtol=1e-5), "f32 mismatch (small batch)"

    # 2) ragged batch, default tile -> auto-split into 2 grid steps (v7x megacore);
    #    the partial last block exercises the no-pad path.
    x2 = jax.random.normal(k_x2, (300, IN_F), dtype=jnp.float32)
    out2 = jax.block_until_ready(classify_net_forward(x2, params))
    ref2 = reference_forward(x2, params)
    assert out2.shape == (300, 1), out2.shape
    assert jnp.allclose(out2, ref2, atol=1e-5, rtol=1e-5), "f32 mismatch (2-step grid)"

    # 3) small tile -> 3-step grid (Buffered(3) x pipeline) + partial last block
    out3 = jax.block_until_ready(
        classify_net_forward(x2, params, max_batch_tile=128))
    assert jnp.allclose(out3, ref2, atol=1e-5, rtol=1e-5), "f32 mismatch (3-step grid)"

    # 4) bf16 MXU-operand path (cast happens inside the kernel; x stays f32 in HBM)
    out_bf16 = jax.block_until_ready(
        classify_net_forward(x2, params, compute_dtype=jnp.bfloat16))
    assert jnp.allclose(out_bf16, ref2, atol=2e-2, rtol=2e-2), "bf16 mismatch"

    print("KERNEL_OK")
</pallas_src>

<mosaic_0001>
module attributes {stable_mosaic.version = 11 : i64} {
  func.func @_mlp_kernel(%arg0: i32, %arg1: memref<8x15xf32, #tpu.memory_space<vmem>>, %arg2: memref<20x15xf32, #tpu.memory_space<vmem>>, %arg3: memref<20x1xf32, #tpu.memory_space<vmem>>, %arg4: memref<15x20xf32, #tpu.memory_space<vmem>>, %arg5: memref<15x1xf32, #tpu.memory_space<vmem>>, %arg6: memref<15x1xf32, #tpu.memory_space<vmem>>, %arg7: memref<1x1xf32, #tpu.memory_space<vmem>>, %arg8: memref<1x8xf32, #tpu.memory_space<vmem>>) attributes {dimension_semantics = [#tpu.dimension_semantics<parallel>], iteration_bounds = array<i64: 1>, scalar_prefetch = 0 : i64, scratch_operands = 0 : i64, tpu.core_type = #tpu.core_type<tc>, window_params = [{transform_indices = @transform_0, window_bounds = array<i64: 8, 15>}, {pipeline_mode = #tpu.pipeline_mode<synchronous>, transform_indices = @transform_1, window_bounds = array<i64: 20, 15>}, {pipeline_mode = #tpu.pipeline_mode<synchronous>, transform_indices = @transform_2, window_bounds = array<i64: 20, 1>}, {pipeline_mode = #tpu.pipeline_mode<synchronous>, transform_indices = @transform_3, window_bounds = array<i64: 15, 20>}, {pipeline_mode = #tpu.pipeline_mode<synchronous>, transform_indices = @transform_4, window_bounds = array<i64: 15, 1>}, {pipeline_mode = #tpu.pipeline_mode<synchronous>, transform_indices = @transform_5, window_bounds = array<i64: 15, 1>}, {pipeline_mode = #tpu.pipeline_mode<synchronous>, transform_indices = @transform_6, window_bounds = array<i64: 1, 1>}, {transform_indices = @transform_7, window_bounds = array<i64: 1, 8>}]} {
    %c0 = arith.constant 0 : index
    %c0_0 = arith.constant 0 : index
    %0 = vector.load %arg1[%c0, %c0_0] : memref<8x15xf32, #tpu.memory_space<vmem>>, vector<8x15xf32>
    %1 = tpu.transpose %0, [1, 0] : vector<8x15xf32> -> vector<15x8xf32>
    %c0_1 = arith.constant 0 : index
    %c0_2 = arith.constant 0 : index
    %2 = vector.load %arg2[%c0_1, %c0_2] : memref<20x15xf32, #tpu.memory_space<vmem>>, vector<20x15xf32>
    %cst = arith.constant dense<0.000000e+00> : vector<20x8xf32>
    %3 = tpu.matmul %2, %1, %cst {dimension_numbers = #tpu.dot_dimension_numbers<[1], [0], [0], [1], [0, 0, 1, 1], [], []>} : vector<20x15xf32>, vector<15x8xf32>, vector<20x8xf32> -> vector<20x8xf32>
    %c0_3 = arith.constant 0 : index
    %c0_4 = arith.constant 0 : index
    %4 = vector.load %arg3[%c0_3, %c0_4] : memref<20x1xf32, #tpu.memory_space<vmem>>, vector<20x1xf32>
    %5 = vector.broadcast %4 : vector<20x1xf32> to vector<20x8xf32>
    %6 = arith.addf %3, %5 : vector<20x8xf32>
    %cst_5 = arith.constant 0.000000e+00 : f32
    %7 = vector.broadcast %cst_5 : f32 to vector<20x8xf32>
    %8 = arith.maximumf %6, %7 : vector<20x8xf32>
    %c0_6 = arith.constant 0 : index
    %c0_7 = arith.constant 0 : index
    %9 = vector.load %arg4[%c0_6, %c0_7] : memref<15x20xf32, #tpu.memory_space<vmem>>, vector<15x20xf32>
    %cst_8 = arith.constant dense<0.000000e+00> : vector<15x8xf32>
    %10 = tpu.matmul %9, %8, %cst_8 {dimension_numbers = #tpu.dot_dimension_numbers<[1], [0], [0], [1], [0, 0, 1, 1], [], []>} : vector<15x20xf32>, vector<20x8xf32>, vector<15x8xf32> -> vector<15x8xf32>
    %c0_9 = arith.constant 0 : index
    %c0_10 = arith.constant 0 : index
    %11 = vector.load %arg5[%c0_9, %c0_10] : memref<15x1xf32, #tpu.memory_space<vmem>>, vector<15x1xf32>
    %12 = vector.broadcast %11 : vector<15x1xf32> to vector<15x8xf32>
    %13 = arith.addf %10, %12 : vector<15x8xf32>
    %cst_11 = arith.constant 0.000000e+00 : f32
    %14 = vector.broadcast %cst_11 : f32 to vector<15x8xf32>
    %15 = arith.maximumf %13, %14 : vector<15x8xf32>
    %c0_12 = arith.constant 0 : index
    %c0_13 = arith.constant 0 : index
    %16 = vector.load %arg6[%c0_12, %c0_13] : memref<15x1xf32, #tpu.memory_space<vmem>>, vector<15x1xf32>
    %17 = vector.broadcast %16 : vector<15x1xf32> to vector<15x8xf32>
    %18 = arith.mulf %15, %17 : vector<15x8xf32>
    %cst_14 = arith.constant dense<0.000000e+00> : vector<8xf32>
    %19 = vector.multi_reduction <add>, %18, %cst_14 [0] : vector<15x8xf32> to vector<8xf32>
    %20 = vector.shape_cast %19 : vector<8xf32> to vector<1x8xf32>
    %c0_15 = arith.constant 0 : index
    %c0_16 = arith.constant 0 : index
    %21 = vector.load %arg7[%c0_15, %c0_16] : memref<1x1xf32, #tpu.memory_space<vmem>>, vector<1x1xf32>
    %22 = vector.broadcast %21 : vector<1x1xf32> to vector<1x8xf32>
    %23 = arith.addf %20, %22 : vector<1x8xf32>
    %c0_17 = arith.constant 0 : index
    %c0_18 = arith.constant 0 : index
    %24 = vector.load %arg8[%c0_17, %c0_18] : memref<1x8xf32, #tpu.memory_space<vmem>>, vector<1x8xf32>
    tpu.vector_store %arg8[%c0_17, %c0_18], %23 {strides = array<i32>} : memref<1x8xf32, #tpu.memory_space<vmem>>, vector<1x8xf32>,
    return
  }
  func.func @transform_0(%arg0: i32) -> (i32, i32) {
    %c0_i32 = arith.constant 0 : i32
    %c0_i32_0 = arith.constant 0 : i32
    return %arg0, %c0_i32 : i32, i32
  }
  func.func @transform_1(%arg0: i32) -> (i32, i32) {
    %c0_i32 = arith.constant 0 : i32
    %c0_i32_0 = arith.constant 0 : i32
    %c0_i32_1 = arith.constant 0 : i32
    return %c0_i32, %c0_i32_0 : i32, i32
  }
  func.func @transform_2(%arg0: i32) -> (i32, i32) {
    %c0_i32 = arith.constant 0 : i32
    %c0_i32_0 = arith.constant 0 : i32
    %c0_i32_1 = arith.constant 0 : i32
    return %c0_i32, %c0_i32_0 : i32, i32
  }
  func.func @transform_3(%arg0: i32) -> (i32, i32) {
    %c0_i32 = arith.constant 0 : i32
    %c0_i32_0 = arith.constant 0 : i32
    %c0_i32_1 = arith.constant 0 : i32
    return %c0_i32, %c0_i32_0 : i32, i32
  }
  func.func @transform_4(%arg0: i32) -> (i32, i32) {
    %c0_i32 = arith.constant 0 : i32
    %c0_i32_0 = arith.constant 0 : i32
    %c0_i32_1 = arith.constant 0 : i32
    return %c0_i32, %c0_i32_0 : i32, i32
  }
  func.func @transform_5(%arg0: i32) -> (i32, i32) {
    %c0_i32 = arith.constant 0 : i32
    %c0_i32_0 = arith.constant 0 : i32
    %c0_i32_1 = arith.constant 0 : i32
    return %c0_i32, %c0_i32_0 : i32, i32
  }
  func.func @transform_6(%arg0: i32) -> (i32, i32) {
    %c0_i32 = arith.constant 0 : i32
    %c0_i32_0 = arith.constant 0 : i32
    %c0_i32_1 = arith.constant 0 : i32
    return %c0_i32, %c0_i32_0 : i32, i32
  }
  func.func @transform_7(%arg0: i32) -> (i32, i32) {
    %c0_i32 = arith.constant 0 : i32
    %c0_i32_0 = arith.constant 0 : i32
    return %c0_i32, %arg0 : i32, i32
  }
}

</mosaic_0001>

<bundles_post_ra>
// kernel: tpu_custom_call.1
= control target key start
LH: loop header
LB: loop body
LE: loop exit
PB: predicated region body
PF: predicated region fallthrough
CT: control target
= control target key end

     0   :  { %s478_s0 = inlined_call_operand.vmem [shape: f32[8,15], index: 0, kind: input, shape index: {}]   ;;  %s479_s1 = inlined_call_operand.vmem [shape: f32[20,15], index: 1, kind: input, shape index: {}]   ;;  %s480_s2 = inlined_call_operand.vmem [shape: f32[20,1], index: 2, kind: input, shape index: {}]   ;;  %s481_s3 = inlined_call_operand.vmem [shape: f32[15,20], index: 3, kind: input, shape index: {}]   ;;  %s482_s4 = inlined_call_operand.vmem [shape: f32[15,1], index: 4, kind: input, shape index: {}]   ;;  %s483_s5 = inlined_call_operand.vmem [shape: f32[15,1], index: 5, kind: input, shape index: {}]   ;;  %s484_s6 = inlined_call_operand.<no memory space> [shape: f32[1,1], index: 6, kind: input, shape index: {}]   ;;  %s485_s7 = inlined_call_operand.hbm [shape: f32[1,8], index: 7, kind: output, shape index: {}]  }
   0x1   :  { %v12_v0 = vstv %s484_s6 }
   0x2   :  { %13 = vst [vmem:[#allocation2] sm:$0x1] %v12_v0 }
   0x3   :  { %v29_v1 = vld [vmem:[%s478_s0] sm:$0xff]  ;;  %vm51_vm0 = vcmask 121856   ;;  %v371_v2 = vmov 0.0   ;;  %vm372_vm1 = vmmov 0   ;;  %v373_v5 = vmov 0   ;;  %v34_v7 = vld [vmem:[%s480_s2 + $0x8] sm:$0xff] }
   0x4   :  { %317 = vmatprep.subr.mxu0 %v371_v2  ;;  %319 = vmatprep.mubr.msk.f32.mxu0 %vm372_vm1, %v371_v2  ;;  %v33_v3 = vld [vmem:[%s480_s2] sm:$0xff]  ;;  %v35_v6 = vld [vmem:[%s480_s2 + $0x10] sm:$0xf] }
   0x5   :  { %318 = vmatpush3.xpose.msk.msra.mxu0 %vm51_vm0, %v29_v1  ;;  %v30_v4 = vld [vmem:[%s479_s1] sm:$0xff]  ;;  %345 = vset.pattern.permute.xlu0 %v373_v5 }
   0x6   :  { %38 = vperm.xlu0 %345, %v33_v3   ;;  %346 = vset.pattern.permute.xlu1 %v373_v5 }
   0x7   :  { %48 = vperm.xlu1 %346, %v35_v6  }
   0x8   :  { %14 = vsyncpa [#allocation4], 0  ;;  %320 = vmatmul.mubr.msk.f32.vlgmr.msra.gmra.mrb[0].mxu0 %vm51_vm0, %v30_v4  ;;  %v149_v8 = vld [vmem:[%s482_s4] sm:$0xff]  ;;  %v31_v9 = vld [vmem:[%s479_s1 + $0x8] sm:$0xff]  ;;  %vm161_vm2 = vcmask 162816   ;;  %vm168_vm3 = vcmask 1043456   ;;  %v280_v47 = vlaneseq }
   0x9   :  { %322 = vmatprep.mubr.msk.f32.mxu0 %vm372_vm1, %v371_v2  ;;  %v150_v10 = vld [vmem:[%s482_s4 + $0x8] sm:$0x7f]  ;;  %v249_v11 = vld [vmem:[%s483_s5] sm:$0xff]  ;;  %v32_v12 = vld [vmem:[%s479_s1 + $0x10] sm:$0xf]  ;;  %vm265_vm4 = vcmask 63488  }
   0xa   :  { %43 = vperm.xlu0 %345, %v34_v7   ;;  %v250_v13 = vld [vmem:[%s483_s5 + $0x8] sm:$0x7f]  ;;  %v274_v14 = vld [vmem:[#allocation2] sm:$0x1]  ;;  %vm263_vm5 = vcmask 64512   ;;  %v281_v50 = vshrl.u32 %v280_v47, 7 }
   0xb   :  { %153 = vperm.xlu1 %346, %v149_v8   ;;  %v147_v15 = vld [vmem:[%s481_s3] sm:$0xff]  ;;  %v148_v32 = vld [vmem:[%s481_s3 + $0x8] sm:$0x7f]  ;;  %s374_s3 = smov [#allocation3]   ;;  %vm285_vm6 = vcmask 57344  }
   0xc   :  { %323 = vmatmul.mubr.msk.f32.gmra.mrb[2].mxu0 %vm51_vm0, %v31_v9  ;;  %334 = vmatprep.mubr.msk.f32.mxu1 %vm161_vm2, %v147_v15  ;;  %v282_v53 = vsub.s32 0, %v281_v50  ;;  %s293_s23 = sshll.u32 %s374_s3, 4  ;;  %s294_s23 = int_to_ptr.vmem [resolvable:$true] %s293_s23 }
   0xd   :  { %325 = vmatprep.mubr.msk.f32.mxu0 %vm372_vm1, %v371_v2  ;;  %s347_s24 = scalar_lea.vmem %s294_s23, 16  ;;  %s351_s25 = scalar_lea.vmem %s294_s23, 32 }
   0xe   :  { %158 = vperm.xlu0 %345, %v150_v10   ;;  %p348_p0 = scmp.ne.s32.totalorder %s294_s23, %s347_s24  ;;  %p352_p1 = scmp.lt.s32.totalorder %s294_s23, %s294_s23 }
   0xf   :  { %253 = vperm.xlu1 %346, %v249_v11   ;;  %p353_p2 = scmp.lt.s32.totalorder %s351_s25, %s347_s24 }
  0x10   :  { %326 = vmatmul.mubr.msk.f32.gmra.mrb[4].mxu0 %vm51_vm0, %v32_v12 }
  0x11   :  { %p354_p3 = por %p353_p2, %p352_p1 }
  0x12   :  { %258 = vperm.xlu0 %345, %v250_v13  }
  0x13   :  { %277 = vperm.xlu1 %346, %v274_v14   ;;  %p355_p4 = pnand %p354_p3, %p348_p0 }
  0x85   :  { %v39_v16 = vpop.permute.xlu0 %38 }
  0x86   :  { %v49_v26 = vpop.permute.xlu1 %48 }
  0x89   :  { %v44_v20 = vpop.permute.xlu0 %43 }
  0x8a   :  { %v154_v34 = vpop.permute.xlu1 %153 }
  0x8d   :  { %v159_v33 = vpop.permute.xlu0 %158 }
  0x8e   :  { %v254_v42 = vpop.permute.xlu1 %253 }
  0x91   :  { %v259_v40 = vpop.permute.xlu0 %258 }
  0x92   :  { %v278_v55 = vpop.permute.xlu1 %277 }
  0x93   :  { %v283_v57 = vrot.slane %v278_v55, %v282_v53 }
  0xdb   :  { %v130_v17 = vpop.f32.mrb[0].mxu0 }
  0xdc   :  { %v321_v18 = vpop.f32.mrb[1].mxu0  ;;  %v131_v19 = vadd.f32 %v130_v17, %v39_v16 }
  0xde   :  { %v144_v24 = vmax.f32 %v131_v19, 0.0 }
  0xdf   :  { %v135_v21 = vpop.f32.mrb[2].mxu0 }
  0xe0   :  { %v136_v22 = vadd.f32 %v135_v21, %v44_v20  ;;  %v324_v23 = vpop.f32.mrb[3].mxu0 }
  0xe2   :  { %v145_v25 = vmax.f32 %v136_v22, 0.0 }
  0xe3   :  { %v140_v27 = vpop.f32.mrb[4].mxu0 }
  0xe4   :  { %v141_v28 = vadd.f32 %v140_v27, %v49_v26  ;;  %v327_v29 = vpop.f32.mrb[5].mxu0  ;;  %v337_v30 = vpack.c.bf16 %v145_v25, %v144_v24 }
  0xe6   :  { %v146_v31 = vmax.f32 %v141_v28, 0.0  ;;  %338 = vmatprep.subr.bf16.mxu1 %v337_v30 }
  0xe7   :  { %340 = vmatpush3.bf16.msra.mxu1 %v337_v30 }
  0xe8   :  { %332 = vmatprep.subr.msk.mxu1 %vm168_vm3, %v146_v31 }
  0xeb   :  { %333 = vmatpush3.msk.msra.mxu1 %vm168_vm3, %v146_v31 }
  0xec   :  { %335 = vmatmul.mubr.msk.f32.vlgmr.msra.gmra.mrb[0].mxu1 %vm161_vm2, %v148_v32 }
 0x1bf   :  { %v336_v35 = vpop.f32.mrb[0].mxu1 }
 0x1c0   :  { %v244_v36 = vadd.f32 %v336_v35, %v159_v33  ;;  %v238_v37 = vpop.f32.mrb[1].mxu1 }
 0x1c1   :  { %v239_v38 = vadd.f32 %v238_v37, %v154_v34 }
 0x1c2   :  { %v248_v39 = vmax.f32 %v244_v36, 0.0 }
 0x1c3   :  { %v247_v41 = vmax.f32 %v239_v38, 0.0 }
 0x1c4   :  { %v262_v43 = vmul.f32 %v259_v40, %v248_v39 }
 0x1c5   :  { %v261_v44 = vmul.f32 %v254_v42, %v247_v41 }
 0x1c6   :  { %v266_v45 = vsel %vm265_vm4, %v262_v43, 0.0 }
 0x1c7   :  { %v264_v46 = vsel %vm263_vm5, %v261_v44, 0.0 }
 0x1c8   :  { %v267_v48 = vadd.f32 %v266_v45, %v264_v46 }
 0x1ca   :  { %v268_v49 = vrot.slane %v267_v48, 4 }
 0x1cc   :  { %v269_v51 = vadd.f32 %v268_v49, %v267_v48 }
 0x1ce   :  { %v270_v52 = vrot.slane %v269_v51, 2 }
 0x1d0   :  { %v271_v54 = vadd.f32 %v270_v52, %v269_v51 }
 0x1d2   :  { %v272_v56 = vrot.slane %v271_v54, 1 }
 0x1d4   :  { %v273_v58 = vadd.f32 %v272_v56, %v271_v54 }
 0x1d6   :  { %v284_v59 = vadd.f32 %v283_v57, %v273_v58 }
 0x1d8   :  { %286 = vst.msk [vmem:[#allocation3] sm:$0x1] %vm285_vm6, %v284_v59 }
 0x1d9   :  { %358 = shalt.err (!%p355_p4)
}
 0x1da   :  { %s359_s28 = scalar_lea.hbm %s485_s7, 16 }
 0x1db   :  { %p360_p5 = scmp.ne.s32.totalorder %s485_s7, %s359_s28  ;;  %p363_p6 = scmp.lt.u32.totalorder %s359_s28, %s485_s7 }
 0x1dd   :  { %p365_p7 = pnand %p363_p6, %p360_p5 }
 0x1df   :  { %368 = shalt.err (!%p365_p7)
}
 0x1e0   :  { %296 = dma.vmem_to_hbm [thread:$0]  %s294_s23, 16, %s485_s7, [#allocation4]  }
 0x1e1   :  { %369 = dma.done.wait [#allocation4], 16  }
 0x1e2   :  { %370 = vsyncadd [#allocation4], 4294967280 }
 0x1e3   :  { %300 = vsyncpa [#allocation4], 1 }

</bundles_post_ra>
